<compile_context>
chip_gen: v5e
topology: v5e:2x2
jax: 0.10.0
libtpu: 0.0.40
codegen_flags: <defaults>
</compile_context>

<pallas_src>
import functools

import jax
import jax.numpy as jnp
from jax.experimental import pallas as pl
from jax.experimental.pallas import tpu as pltpu


def _spatial_attention_kernel(w_ref, x_ref, o_ref, sum_ref, max_ref, *, inv_c, group):
    # w_ref:   (6,) f32 in SMEM  -- flattened Conv1d(2,1,3) weight
    # x_ref:   (tile_n, tile_c, L) block of x in VMEM
    # o_ref:   (tile_n, L) lane-dense output block in VMEM
    # sum_ref / max_ref: (tile_n, group, L) f32 running-reduction scratch
    k = pl.program_id(1)

    @pl.when(k == 0)
    def _init():
        sum_ref[...] = jnp.zeros(sum_ref.shape, sum_ref.dtype)
        max_ref[...] = jnp.full(max_ref.shape, -jnp.inf, max_ref.dtype)

    x = x_ref[...].astype(jnp.float32)                     # (tn, tc, L)
    tn, tc, l = x.shape
    if group == 1:
        # Fallback path (tile_c not a multiple of the native sublane count).
        part_sum = jnp.sum(x, axis=1, keepdims=True)       # (tn, 1, L)
        part_max = jnp.max(x, axis=1, keepdims=True)
    else:
        # Layout-preserving split of the sublane dim into groups of `group`;
        # the reduce over axis=1 is pure VALU (no per-step XLU work).
        xg = x.reshape(tn, tc // group, group, l)
        part_sum = jnp.sum(xg, axis=1)                     # (tn, group, L)
        part_max = jnp.max(xg, axis=1)

    sum_ref[...] = sum_ref[...] + part_sum
    max_ref[...] = jnp.maximum(max_ref[...], part_max)

    @pl.when(k == pl.num_programs(1) - 1)
    def _finalize():
        # Single cross-sublane collapse, done once per output tile.
        avg = jnp.sum(sum_ref[...], axis=1) * inv_c        # (tn, L) mean over C
        mx = jnp.max(max_ref[...], axis=1)                 # (tn, L) max over C

        # 3-tap shifts with zero padding at both ends (Conv1d padding=1).
        zero = jnp.zeros_like(avg[:, :1])
        prev_a = jnp.concatenate([zero, avg[:, :-1]], axis=1)   # avg[l-1]
        next_a = jnp.concatenate([avg[:, 1:], zero], axis=1)    # avg[l+1]
        prev_m = jnp.concatenate([zero, mx[:, :-1]], axis=1)    # max[l-1]
        next_m = jnp.concatenate([mx[:, 1:], zero], axis=1)     # max[l+1]

        # Hoist the six conv taps (scalar SMEM reads) once.
        w00, w01, w02 = w_ref[0], w_ref[1], w_ref[2]       # taps on the mean channel
        w10, w11, w12 = w_ref[3], w_ref[4], w_ref[5]       # taps on the max channel

        out = (w00 * prev_a + w01 * avg + w02 * next_a
               + w10 * prev_m + w11 * mx + w12 * next_m)
        o_ref[...] = jax.nn.sigmoid(out).astype(o_ref.dtype)


def _pick_tile(extent, target, align):
    """Largest divisor of `extent` that is <= target, preferring multiples of
    `align`. Never returns anything larger than `target` (so a chosen VMEM
    budget is never exceeded)."""
    target = max(1, min(target, extent))
    if extent <= target:
        return extent
    d = (target // align) * align
    while d >= align:
        if extent % d == 0:
            return d
        d -= align
    for d in range(target, 0, -1):
        if extent % d == 0:
            return d
    return 1


def spatial_attention(x, conv_weight, *, tile_n=None, tile_c=None):
    """x: (N, C, L); conv_weight: (1, 2, 3) Conv1d(2, 1, 3, padding=1, bias=False)."""
    n, c, l = x.shape
    elem = x.dtype.itemsize
    # Native sublane count for this dtype: 8 (f32), 16 (bf16), 32 (int8/fp8).
    align = max(8, 32 // elem)

    # Per-x-block budget: 8 MiB everywhere (safe inside v7x's 64 MiB physical
    # VMEM when double-buffered), bumped to 16 MiB on 128-MiB-VMEM chips.
    budget = 8 << 20
    try:
        cap = getattr(pltpu.get_tpu_info(), "vmem_capacity_bytes", 0)
        if cap >= (96 << 20):
            budget = 16 << 20
    except Exception:
        pass

    row_bytes = l * elem
    if tile_n is None:
        # tile_n: at most 256, small enough that one `align`-channel slab fits
        # the budget, and <= ~n//2 so the parallel batch axis yields >= 2 blocks
        # (keeps both v7x TensorCores busy).
        target_n = min(256, max(align, budget // max(1, align * row_bytes)))
        if n >= 2 * align:
            target_n = min(target_n, max(align, n // 2))
        tile_n = _pick_tile(n, target_n, align)
    if tile_c is None:
        # tile_c sized from the remaining per-block budget given tile_n.
        target_c = max(align, budget // max(1, tile_n * row_bytes))
        tile_c = _pick_tile(c, target_c, align)

    assert n % tile_n == 0 and c % tile_c == 0, "tile sizes must divide N and C"
    grid = (n // tile_n, c // tile_c)

    # Sublane-grouped accumulators (hoists the XLU collapse to finalize) only
    # when the layout allows it and the f32 scratch stays within ~8 MiB.
    group = 1
    if tile_c % align == 0 and 2 * tile_n * align * l * 4 <= (8 << 20):
        group = align

    # Double-buffered x + out blocks, plus two f32 scratch accumulators.
    vmem_bytes = (2 * tile_n * tile_c * l * elem
                  + 2 * tile_n * l * elem
                  + 2 * tile_n * group * l * 4)
    vmem_limit = min(int(vmem_bytes * 1.25) + (2 << 20), 64 << 20)

    w6 = conv_weight.reshape(6).astype(jnp.float32)        # flat SMEM scalar table
    kernel = functools.partial(_spatial_attention_kernel, inv_c=1.0 / c, group=group)

    out2d = pl.pallas_call(
        kernel,
        out_shape=jax.ShapeDtypeStruct((n, l), x.dtype),
        grid_spec=pltpu.PrefetchScalarGridSpec(
            num_scalar_prefetch=0,
            grid=grid,
            in_specs=[
                pl.BlockSpec(memory_space=pltpu.SMEM),                      # conv taps
                pl.BlockSpec((tile_n, tile_c, l), lambda i, k: (i, k, 0)),  # x tile
            ],
            out_specs=pl.BlockSpec((tile_n, l), lambda i, k: (i, 0)),
            scratch_shapes=[
                pltpu.VMEM((tile_n, group, l), jnp.float32),                # running sum
                pltpu.VMEM((tile_n, group, l), jnp.float32),                # running max
            ],
        ),
        compiler_params=pltpu.CompilerParams(
            dimension_semantics=("parallel", "arbitrary"),
            vmem_limit_bytes=vmem_limit,
        ),
        cost_estimate=pl.CostEstimate(
            flops=2 * n * c * l + 12 * n * l,
            transcendentals=n * l,
            bytes_accessed=n * c * l * elem + n * l * elem + 6 * 4,
        ),
    )(w6, x)

    # Lane-dense (N, L) stores in-kernel; add the singleton channel dim outside.
    return out2d.reshape(n, 1, l)


def _reference(x, conv_weight):
    # Plain-JAX reference mirroring the PyTorch forward.
    avg = jnp.mean(x, axis=1, keepdims=True)        # (N,1,L)
    mx = jnp.max(x, axis=1, keepdims=True)          # (N,1,L)
    cat = jnp.concatenate([avg, mx], axis=1)        # (N,2,L)
    out = jax.lax.conv_general_dilated(
        cat, conv_weight, window_strides=(1,), padding=((1, 1),),
        dimension_numbers=("NCH", "OIH", "NCH"))
    return jax.nn.sigmoid(out)


if __name__ == "__main__":
    key = jax.random.PRNGKey(0)
    kx, kw = jax.random.split(key)

    # Conv1d-style NCL input: batch=8, channels=16, length=128 (lane-aligned).
    x = jax.random.normal(kx, (8, 16, 128), dtype=jnp.float32)
    # Deterministic synthetic Conv1d(2, 1, 3, bias=False) weight: shape (1, 2, 3).
    conv_weight = jax.random.normal(kw, (1, 2, 3), dtype=jnp.float32) * 0.1

    ref = _reference(x, conv_weight)

    # Default (auto) tiling.
    out = jax.block_until_ready(spatial_attention(x, conv_weight))
    assert out.shape == (8, 1, 128)
    assert jnp.allclose(out, ref, atol=1e-5, rtol=1e-5)

    # Force a multi-step C reduction (grid = (1, 2)) to exercise the
    # init / accumulate / finalize pipeline.
    out2 = jax.block_until_ready(spatial_attention(x, conv_weight, tile_n=8, tile_c=8))
    assert jnp.allclose(out2, ref, atol=1e-5, rtol=1e-5)

    print("KERNEL_OK")
</pallas_src>

<mosaic_0001>
module attributes {stable_mosaic.version = 11 : i64} {
  func.func @_spatial_attention_kernel(%arg0: i32, %arg1: i32, %arg2: memref<6xf32, #tpu.memory_space<smem>>, %arg3: memref<8x16x128xf32, #tpu.memory_space<vmem>>, %arg4: memref<8x128xf32, #tpu.memory_space<vmem>>, %arg5: memref<8x8x128xf32, #tpu.memory_space<vmem>>, %arg6: memref<8x8x128xf32, #tpu.memory_space<vmem>>) attributes {dimension_semantics = [#tpu.dimension_semantics<parallel>, #tpu.dimension_semantics<arbitrary>], iteration_bounds = array<i64: 1, 1>, scalar_prefetch = 0 : i64, scratch_operands = 2 : i64, tpu.core_type = #tpu.core_type<tc>, window_params = [{transform_indices = @transform_0, window_bounds = array<i64: 6>}, {transform_indices = @transform_1, window_bounds = array<i64: 8, 16, 128>}, {transform_indices = @transform_2, window_bounds = array<i64: 8, 128>}]} {
    %c0_i32 = arith.constant 0 : i32
    %0 = arith.cmpi eq, %arg1, %c0_i32 : i32
    %1 = arith.extui %0 : i1 to i32
    %c0_i32_0 = arith.constant 0 : i32
    %2 = arith.cmpi ne, %1, %c0_i32_0 : i32
    scf.if %2 {
      %cst_18 = arith.constant 0.000000e+00 : f32
      %16 = vector.broadcast %cst_18 : f32 to vector<8x8x128xf32>
      %c0_19 = arith.constant 0 : index
      %c0_20 = arith.constant 0 : index
      %c0_21 = arith.constant 0 : index
      %17 = vector.load %arg5[%c0_19, %c0_20, %c0_21] : memref<8x8x128xf32, #tpu.memory_space<vmem>>, vector<8x8x128xf32>
      tpu.vector_store %arg5[%c0_19, %c0_20, %c0_21], %16 {strides = array<i32>} : memref<8x8x128xf32, #tpu.memory_space<vmem>>, vector<8x8x128xf32>,
      %cst_22 = arith.constant 0xFF800000 : f32
      %18 = vector.broadcast %cst_22 : f32 to vector<8x8x128xf32>
      %c0_23 = arith.constant 0 : index
      %c0_24 = arith.constant 0 : index
      %c0_25 = arith.constant 0 : index
      %19 = vector.load %arg6[%c0_23, %c0_24, %c0_25] : memref<8x8x128xf32, #tpu.memory_space<vmem>>, vector<8x8x128xf32>
      tpu.vector_store %arg6[%c0_23, %c0_24, %c0_25], %18 {strides = array<i32>} : memref<8x8x128xf32, #tpu.memory_space<vmem>>, vector<8x8x128xf32>,
    } else {
    }
    %c0 = arith.constant 0 : index
    %c0_1 = arith.constant 0 : index
    %c0_2 = arith.constant 0 : index
    %3 = vector.load %arg3[%c0, %c0_1, %c0_2] : memref<8x16x128xf32, #tpu.memory_space<vmem>>, vector<8x16x128xf32>
    %4 = vector.shape_cast %3 : vector<8x16x128xf32> to vector<8x2x8x128xf32>
    %cst = arith.constant dense<0.000000e+00> : vector<8x8x128xf32>
    %5 = vector.multi_reduction <add>, %4, %cst [1] : vector<8x2x8x128xf32> to vector<8x8x128xf32>
    %cst_3 = arith.constant dense<0xFF800000> : vector<8x8x128xf32>
    %6 = vector.multi_reduction <maximumf>, %4, %cst_3 [1] : vector<8x2x8x128xf32> to vector<8x8x128xf32>
    %c0_4 = arith.constant 0 : index
    %c0_5 = arith.constant 0 : index
    %c0_6 = arith.constant 0 : index
    %7 = vector.load %arg5[%c0_4, %c0_5, %c0_6] : memref<8x8x128xf32, #tpu.memory_space<vmem>>, vector<8x8x128xf32>
    %8 = arith.addf %7, %5 : vector<8x8x128xf32>
    %c0_7 = arith.constant 0 : index
    %c0_8 = arith.constant 0 : index
    %c0_9 = arith.constant 0 : index
    %9 = vector.load %arg5[%c0_7, %c0_8, %c0_9] : memref<8x8x128xf32, #tpu.memory_space<vmem>>, vector<8x8x128xf32>
    tpu.vector_store %arg5[%c0_7, %c0_8, %c0_9], %8 {strides = array<i32>} : memref<8x8x128xf32, #tpu.memory_space<vmem>>, vector<8x8x128xf32>,
    %c0_10 = arith.constant 0 : index
    %c0_11 = arith.constant 0 : index
    %c0_12 = arith.constant 0 : index
    %10 = vector.load %arg6[%c0_10, %c0_11, %c0_12] : memref<8x8x128xf32, #tpu.memory_space<vmem>>, vector<8x8x128xf32>
    %11 = arith.maximumf %10, %6 : vector<8x8x128xf32>
    %c0_13 = arith.constant 0 : index
    %c0_14 = arith.constant 0 : index
    %c0_15 = arith.constant 0 : index
    %12 = vector.load %arg6[%c0_13, %c0_14, %c0_15] : memref<8x8x128xf32, #tpu.memory_space<vmem>>, vector<8x8x128xf32>
    tpu.vector_store %arg6[%c0_13, %c0_14, %c0_15], %11 {strides = array<i32>} : memref<8x8x128xf32, #tpu.memory_space<vmem>>, vector<8x8x128xf32>,
    %c0_i32_16 = arith.constant 0 : i32
    %13 = arith.cmpi eq, %arg1, %c0_i32_16 : i32
    %14 = arith.extui %13 : i1 to i32
    %c0_i32_17 = arith.constant 0 : i32
    %15 = arith.cmpi ne, %14, %c0_i32_17 : i32
    scf.if %15 {
      %c0_18 = arith.constant 0 : index
      %c0_19 = arith.constant 0 : index
      %c0_20 = arith.constant 0 : index
      %16 = vector.load %arg5[%c0_18, %c0_19, %c0_20] : memref<8x8x128xf32, #tpu.memory_space<vmem>>, vector<8x8x128xf32>
      %cst_21 = arith.constant dense<0.000000e+00> : vector<8x128xf32>
      %17 = vector.multi_reduction <add>, %16, %cst_21 [1] : vector<8x8x128xf32> to vector<8x128xf32>
      %cst_22 = arith.constant 6.250000e-02 : f32
      %18 = vector.broadcast %cst_22 : f32 to vector<8x128xf32>
      %19 = arith.mulf %17, %18 : vector<8x128xf32>
      %c0_23 = arith.constant 0 : index
      %c0_24 = arith.constant 0 : index
      %c0_25 = arith.constant 0 : index
      %20 = vector.load %arg6[%c0_23, %c0_24, %c0_25] : memref<8x8x128xf32, #tpu.memory_space<vmem>>, vector<8x8x128xf32>
      %cst_26 = arith.constant dense<0xFF800000> : vector<8x128xf32>
      %21 = vector.multi_reduction <maximumf>, %20, %cst_26 [1] : vector<8x8x128xf32> to vector<8x128xf32>
      %cst_27 = arith.constant 0.000000e+00 : f32
      %22 = vector.broadcast %cst_27 : f32 to vector<8x1xf32>
      %23 = vector.extract_strided_slice %19 {offsets = [0, 0], sizes = [8, 127], strides = [1, 1]} : vector<8x128xf32> to vector<8x127xf32>
      %24 = tpu.concatenate %22, %23 in 1 : vector<8x1xf32>, vector<8x127xf32> -> vector<8x128xf32>
      %25 = vector.extract_strided_slice %19 {offsets = [0, 1], sizes = [8, 127], strides = [1, 1]} : vector<8x128xf32> to vector<8x127xf32>
      %26 = tpu.concatenate %25, %22 in 1 : vector<8x127xf32>, vector<8x1xf32> -> vector<8x128xf32>
      %27 = vector.extract_strided_slice %21 {offsets = [0, 0], sizes = [8, 127], strides = [1, 1]} : vector<8x128xf32> to vector<8x127xf32>
      %28 = tpu.concatenate %22, %27 in 1 : vector<8x1xf32>, vector<8x127xf32> -> vector<8x128xf32>
      %29 = vector.extract_strided_slice %21 {offsets = [0, 1], sizes = [8, 127], strides = [1, 1]} : vector<8x128xf32> to vector<8x127xf32>
      %30 = tpu.concatenate %29, %22 in 1 : vector<8x127xf32>, vector<8x1xf32> -> vector<8x128xf32>
      %c0_28 = arith.constant 0 : index
      %31 = memref.load %arg2[%c0_28] : memref<6xf32, #tpu.memory_space<smem>>
      %c1 = arith.constant 1 : index
      %32 = memref.load %arg2[%c1] : memref<6xf32, #tpu.memory_space<smem>>
      %c2 = arith.constant 2 : index
      %33 = memref.load %arg2[%c2] : memref<6xf32, #tpu.memory_space<smem>>
      %c3 = arith.constant 3 : index
      %34 = memref.load %arg2[%c3] : memref<6xf32, #tpu.memory_space<smem>>
      %c4 = arith.constant 4 : index
      %35 = memref.load %arg2[%c4] : memref<6xf32, #tpu.memory_space<smem>>
      %c5 = arith.constant 5 : index
      %36 = memref.load %arg2[%c5] : memref<6xf32, #tpu.memory_space<smem>>
      %37 = vector.broadcast %31 : f32 to vector<8x128xf32>
      %38 = arith.mulf %37, %24 : vector<8x128xf32>
      %39 = vector.broadcast %32 : f32 to vector<8x128xf32>
      %40 = arith.mulf %39, %19 : vector<8x128xf32>
      %41 = arith.addf %38, %40 : vector<8x128xf32>
      %42 = vector.broadcast %33 : f32 to vector<8x128xf32>
      %43 = arith.mulf %42, %26 : vector<8x128xf32>
      %44 = arith.addf %41, %43 : vector<8x128xf32>
      %45 = vector.broadcast %34 : f32 to vector<8x128xf32>
      %46 = arith.mulf %45, %28 : vector<8x128xf32>
      %47 = arith.addf %44, %46 : vector<8x128xf32>
      %48 = vector.broadcast %35 : f32 to vector<8x128xf32>
      %49 = arith.mulf %48, %21 : vector<8x128xf32>
      %50 = arith.addf %47, %49 : vector<8x128xf32>
      %51 = vector.broadcast %36 : f32 to vector<8x128xf32>
      %52 = arith.mulf %51, %30 : vector<8x128xf32>
      %53 = arith.addf %50, %52 : vector<8x128xf32>
      %54 = arith.negf %53 : vector<8x128xf32>
      %55 = math.exp %54 : vector<8x128xf32>
      %cst_29 = arith.constant 1.000000e+00 : f32
      %56 = vector.broadcast %cst_29 : f32 to vector<8x128xf32>
      %57 = arith.addf %56, %55 : vector<8x128xf32>
      %58 = arith.divf %56, %57 : vector<8x128xf32>
      %c0_30 = arith.constant 0 : index
      %c0_31 = arith.constant 0 : index
      %59 = vector.load %arg4[%c0_30, %c0_31] : memref<8x128xf32, #tpu.memory_space<vmem>>, vector<8x128xf32>
      tpu.vector_store %arg4[%c0_30, %c0_31], %58 {strides = array<i32>} : memref<8x128xf32, #tpu.memory_space<vmem>>, vector<8x128xf32>,
    } else {
    }
    return
  }
  func.func @transform_0(%arg0: i32, %arg1: i32) -> i32 {
    %c0_i32 = arith.constant 0 : i32
    %c0_i32_0 = arith.constant 0 : i32
    return %c0_i32 : i32
  }
  func.func @transform_1(%arg0: i32, %arg1: i32) -> (i32, i32, i32) {
    %c0_i32 = arith.constant 0 : i32
    %c0_i32_0 = arith.constant 0 : i32
    return %arg0, %arg1, %c0_i32 : i32, i32, i32
  }
  func.func @transform_2(%arg0: i32, %arg1: i32) -> (i32, i32) {
    %c0_i32 = arith.constant 0 : i32
    %c0_i32_0 = arith.constant 0 : i32
    return %arg0, %c0_i32 : i32, i32
  }
}

</mosaic_0001>

<bundles_post_ra>
// kernel: tpu_custom_call.1
= control target key start
LH: loop header
LB: loop body
LE: loop exit
PB: predicated region body
PF: predicated region fallthrough
CT: control target
= control target key end

     0   :  { %7 = vsyncpa [#allocation7], 0  ;;  %s680_s0 = inlined_call_operand.hbm [shape: f32[6], index: 0, kind: input, shape index: {}]   ;;  %s681_s1 = inlined_call_operand.hbm [shape: f32[8,16,128], index: 1, kind: input, shape index: {}]   ;;  %s682_s2 = inlined_call_operand.hbm [shape: f32[8,128], index: 2, kind: output, shape index: {}]  }
   0x1   :  { %8 = vsyncpa [#allocation5], 0 }
   0x2   :  { %9 = vsyncpa [#allocation6], 0  ;;  %s15_s11 = sshll.u32 %s680_s0, 4  ;;  %s23_s14 = sshll.u32 %s681_s1, 4  ;;  %s16_s11 = int_to_ptr.hbm [resolvable:$true] %s15_s11  ;;  %s24_s14 = int_to_ptr.hbm [resolvable:$true] %s23_s14 }
   0x3   :  { %s509_s15 = smov [#allocation4]   ;;  %s510_s16 = smov [#allocation8]  }
   0x4   :  { %18 = dma.hbm_to_smem %s16_s11, 16, %s509_s15, [#allocation7]  }
   0x5   :  { %s25_s17 = sshll.u32 %s510_s16, 4  ;;  %s511_s18 = smov 128   ;;  %s26_s17 = int_to_ptr.vmem [resolvable:$true] %s25_s17 }
   0x6   :  { %s512_s19 = smov 8  }
   0x7   :  { %31 = dma.hbm_to_vmem [thread:$0]  %s24_s14, 2048, %s26_s17, [#allocation5], %s511_s18, %s511_s18, %s512_s19  }
   0x8   :  { %503 = dma.done.wait [#allocation7], 16  }
   0x9   :  { %504 = vsyncadd [#allocation7], 4294967280 }
   0xa   :  { %505 = dma.done.wait [#allocation5], 2048  }
   0xb   :  { %506 = vsyncadd [#allocation5], 4294965248 }
   0xc   :  { %40 = sfence }
   0xd   :  { %v537_v0 = vld [vmem:[#allocation8] sm:$0xff]  ;;  %v539_v1 = vld [vmem:[#allocation8 + $0x8] sm:$0xff]  ;;  %v541_v2 = vld [vmem:[#allocation8 + $0x10] sm:$0xff]  ;;  %vm272_vm0 = vcmask 1041409   ;;  %vm274_vm1 = vcmask 1042434   ;;  %vm276_vm2 = vcmask 1043459  }
   0xe   :  { %v543_v3 = vld [vmem:[#allocation8 + $0x18] sm:$0xff]  ;;  %v545_v4 = vld [vmem:[#allocation8 + $0x20] sm:$0xff]  ;;  %v547_v5 = vld [vmem:[#allocation8 + $0x28] sm:$0xff]  ;;  %v77_v6 = vadd.f32 %v539_v1, %v537_v0  ;;  %vm278_vm3 = vcmask 1044484   ;;  %vm280_vm4 = vcmask 1045509   ;;  %s426_s0 = sld [smem:[#allocation4 + $0x1]] }
   0xf   :  { %v551_v7 = vld [vmem:[#allocation8 + $0x30] sm:$0xff]  ;;  %v553_v8 = vld [vmem:[#allocation8 + $0x38] sm:$0xff]  ;;  %v555_v9 = vld [vmem:[#allocation8 + $0x40] sm:$0xff]  ;;  %v78_v10 = vadd.f32 %v543_v3, %v541_v2  ;;  %v79_v11 = vadd.f32 %v547_v5, %v545_v4  ;;  %vm282_vm5 = vcmask 1046534   ;;  %vm284_vm6 = vcmask 1047559   ;;  %s513_s1 = smov 1  }
  0x10   :  { %v561_v12 = vld [vmem:[#allocation8 + $0x48] sm:$0xff]  ;;  %v563_v13 = vld [vmem:[#allocation8 + $0x50] sm:$0xff]  ;;  %v565_v14 = vld [vmem:[#allocation8 + $0x58] sm:$0xff]  ;;  %v80_v15 = vadd.f32 %v553_v8, %v551_v7  ;;  %v152_v16 = vrot.slane %v77_v6, 4  ;;  %s514_s20 = smov 127   ;;  %s429_s21 = sld [smem:[#allocation4 + $0x4]] }
  0x11   :  { %v569_v17 = vld [vmem:[#allocation8 + $0x60] sm:$0xff]  ;;  %v571_v18 = vld [vmem:[#allocation8 + $0x68] sm:$0xff]  ;;  %v573_v19 = vld [vmem:[#allocation8 + $0x70] sm:$0xff]  ;;  %v81_v20 = vadd.f32 %v561_v12, %v555_v9  ;;  %v82_v21 = vadd.f32 %v565_v14, %v563_v13  ;;  %v158_v22 = vrot.slane %v78_v10, 4  ;;  %v164_v23 = vrot.slane %v79_v11, 4  ;;  %s319_s22 = sld [smem:[#allocation4]] }
  0x12   :  { %v579_v24 = vld [vmem:[#allocation8 + $0x78] sm:$0xff]  ;;  %v83_v25 = vadd.f32 %v571_v18, %v569_v17  ;;  %v153_v26 = vadd.f32 %v152_v16, %v77_v6  ;;  %v170_v27 = vrot.slane %v80_v15, 4  ;;  %s427_s23 = sld [smem:[#allocation4 + $0x2]]  ;;  %vm289_vm7 = vcmask 7168   ;;  %s515_s26 = smov [#allocation9]  }
  0x13   :  { %v84_v28 = vadd.f32 %v579_v24, %v573_v19  ;;  %v159_v29 = vadd.f32 %v158_v22, %v78_v10  ;;  %v165_v30 = vadd.f32 %v164_v23, %v79_v11  ;;  %v176_v31 = vrot.slane %v81_v20, 4  ;;  %s428_s24 = sld [smem:[#allocation4 + $0x3]]  ;;  %s413_s27 = sshll.u32 %s515_s26, 4  ;;  %s414_s27 = int_to_ptr.vmem [resolvable:$true] %s413_s27 }
  0x14   :  { %v154_v32 = vrot.slane %v153_v26, 2  ;;  %v171_v33 = vadd.f32 %v170_v27, %v80_v15  ;;  %v182_v34 = vrot.slane %v82_v21, 4  ;;  %v188_v35 = vrot.slane %v83_v25, 4  ;;  %s430_s25 = sld [smem:[#allocation4 + $0x5]]  ;;  %s415_s30 = sshll.u32 %s682_s2, 4  ;;  %s416_s30 = int_to_ptr.hbm [resolvable:$true] %s415_s30 }
  0x15   :  { %v160_v36 = vrot.slane %v159_v29, 2  ;;  %v166_v37 = vrot.slane %v165_v30, 2  ;;  %v177_v38 = vadd.f32 %v176_v31, %v81_v20  ;;  %v194_v39 = vrot.slane %v84_v28, 4 }
  0x16   :  { %v155_v40 = vadd.f32 %v154_v32, %v153_v26  ;;  %v172_v41 = vrot.slane %v171_v33, 2  ;;  %v183_v42 = vadd.f32 %v182_v34, %v82_v21  ;;  %v189_v43 = vadd.f32 %v188_v35, %v83_v25 }
  0x17   :  { %v161_v44 = vadd.f32 %v160_v36, %v159_v29  ;;  %v167_v45 = vadd.f32 %v166_v37, %v165_v30  ;;  %v178_v46 = vrot.slane %v177_v38, 2  ;;  %v195_v47 = vadd.f32 %v194_v39, %v84_v28 }
  0x18   :  { %v156_v48 = vrot.slane %v155_v40, 1  ;;  %v173_v49 = vadd.f32 %v172_v41, %v171_v33  ;;  %v184_v50 = vrot.slane %v183_v42, 2  ;;  %v190_v51 = vrot.slane %v189_v43, 2 }
  0x19   :  { %v162_v52 = vrot.slane %v161_v44, 1  ;;  %v168_v53 = vrot.slane %v167_v45, 1  ;;  %v179_v54 = vadd.f32 %v178_v46, %v177_v38  ;;  %v196_v55 = vrot.slane %v195_v47, 2 }
  0x1a   :  { %v157_v56 = vadd.f32 %v156_v48, %v155_v40  ;;  %v174_v57 = vrot.slane %v173_v49, 1  ;;  %v185_v58 = vadd.f32 %v184_v50, %v183_v42  ;;  %v191_v59 = vadd.f32 %v190_v51, %v189_v43 }
  0x1b   :  { %v163_v60 = vadd.f32 %v162_v52, %v161_v44  ;;  %v169_v61 = vadd.f32 %v168_v53, %v167_v45  ;;  %v180_v62 = vrot.slane %v179_v54, 1  ;;  %v197_v63 = vadd.f32 %v196_v55, %v195_v47 }
  0x1c   :  { %v175_v6 = vadd.f32 %v174_v57, %v173_v49  ;;  %v186_v10 = vrot.slane %v185_v58, 1  ;;  %v192_v11 = vrot.slane %v191_v59, 1  ;;  %v585_v15 = vmul.f32 0.0625, %v157_v56 }
  0x1d   :  { %v181_v16 = vadd.f32 %v180_v62, %v179_v54  ;;  %v198_v20 = vrot.slane %v197_v63, 1  ;;  %v587_v21 = vmul.f32 0.0625, %v163_v60  ;;  %v589_v22 = vmul.f32 0.0625, %v169_v61 }
  0x1e   :  { %v187_v23 = vadd.f32 %v186_v10, %v185_v58  ;;  %v193_v25 = vadd.f32 %v192_v11, %v191_v59  ;;  %v591_v26 = vmul.f32 0.0625, %v175_v6  ;;  %v85_v30 = vmax.f32 %v537_v0, %v539_v1 }
  0x1f   :  { %v199_v27 = vadd.f32 %v198_v20, %v197_v63  ;;  %v593_v28 = vmul.f32 0.0625, %v181_v16  ;;  %v273_v29 = vsel %vm272_vm0, %v587_v21, %v585_v15  ;;  %v86_v34 = vmax.f32 %v541_v2, %v543_v3 }
  0x20   :  { %v600_v31 = vmul.f32 0.0625, %v187_v23  ;;  %v602_v32 = vmul.f32 0.0625, %v193_v25  ;;  %v275_v33 = vsel %vm274_vm1, %v589_v22, %v273_v29  ;;  %v87_v37 = vmax.f32 %v545_v4, %v547_v5 }
  0x21   :  { %v608_v35 = vmul.f32 0.0625, %v199_v27  ;;  %v277_v36 = vsel %vm276_vm2, %v591_v26, %v275_v33  ;;  %v88_v0 = vmax.f32 %v551_v7, %v553_v8  ;;  %v620_v39 = vstv %s426_s0 }
  0x22   :  { %v279_v1 = vsel %vm278_vm3, %v593_v28, %v277_v36  ;;  %v89_v2 = vmax.f32 %v555_v9, %v561_v12  ;;  %v90_v3 = vmax.f32 %v563_v13, %v565_v14  ;;  %v91_v5 = vmax.f32 %v569_v17, %v571_v18 }
  0x23   :  { %v281_v38 = vsel %vm280_vm4, %v600_v31, %v279_v1  ;;  %v92_v7 = vmax.f32 %v573_v19, %v579_v24  ;;  %v216_v8 = vrot.slane %v85_v30, 4  ;;  %v222_v41 = vrot.slane %v86_v34, 4 }
  0x24   :  { %v283_v4 = vsel %vm282_vm5, %v602_v32, %v281_v38  ;;  %v228_v42 = vrot.slane %v87_v37, 4  ;;  %v234_v43 = vrot.slane %v88_v0, 4  ;;  %v240_v12 = vrot.slane %v89_v2, 4 }
  0x25   :  { %v285_v40 = vsel %vm284_vm6, %v608_v35, %v283_v4  ;;  %v217_v9 = vmax.f32 %v85_v30, %v216_v8  ;;  %v246_v13 = vrot.slane %v90_v3, 4  ;;  %v252_v14 = vrot.slane %v91_v5, 4 }
  0x26   :  { %286 = vrot.lane.b32.xlu0 %v285_v40, %s513_s1  ;;  %v223_v44 = vmax.f32 %v86_v34, %v222_v41  ;;  %v229_v45 = vmax.f32 %v87_v37, %v228_v42  ;;  %v235_v17 = vmax.f32 %v88_v0, %v234_v43  ;;  %v258_v18 = vrot.slane %v92_v7, 4 }
  0x27   :  { %v218_v46 = vrot.slane %v217_v9, 2  ;;  %v241_v19 = vmax.f32 %v89_v2, %v240_v12  ;;  %v247_v24 = vmax.f32 %v90_v3, %v246_v13  ;;  %v253_v47 = vmax.f32 %v91_v5, %v252_v14 }
  0x28   :  { %v224_v48 = vrot.slane %v223_v44, 2  ;;  %v230_v49 = vrot.slane %v229_v45, 2  ;;  %v236_v50 = vrot.slane %v235_v17, 2  ;;  %v259_v51 = vmax.f32 %v92_v7, %v258_v18 }
  0x29   :  { %v219_v52 = vmax.f32 %v217_v9, %v218_v46  ;;  %v242_v53 = vrot.slane %v241_v19, 2  ;;  %v248_v54 = vrot.slane %v247_v24, 2  ;;  %v254_v55 = vrot.slane %v253_v47, 2 }
  0x2a   :  { %v225_v56 = vmax.f32 %v223_v44, %v224_v48  ;;  %v231_v57 = vmax.f32 %v229_v45, %v230_v49  ;;  %v237_v58 = vmax.f32 %v235_v17, %v236_v50  ;;  %v260_v59 = vrot.slane %v259_v51, 2 }
  0x2b   :  { %v220_v60 = vrot.slane %v219_v52, 1  ;;  %v243_v61 = vmax.f32 %v241_v19, %v242_v53  ;;  %v249_v62 = vmax.f32 %v247_v24, %v248_v54  ;;  %v255_v63 = vmax.f32 %v253_v47, %v254_v55 }
  0x2c   :  { %v226_v6 = vrot.slane %v225_v56, 1  ;;  %v232_v10 = vrot.slane %v231_v57, 1  ;;  %v238_v11 = vrot.slane %v237_v58, 1  ;;  %v261_v16 = vmax.f32 %v259_v51, %v260_v59 }
  0x2d   :  { %v221_v20 = vmax.f32 %v219_v52, %v220_v60  ;;  %v244_v23 = vrot.slane %v243_v61, 1  ;;  %v250_v25 = vrot.slane %v249_v62, 1  ;;  %v256_v27 = vrot.slane %v255_v63, 1 }
  0x2e   :  { %291 = vrot.lane.b32.xlu0 %v285_v40, %s514_s20  ;;  %v227_v29 = vmax.f32 %v225_v56, %v226_v6  ;;  %v233_v30 = vmax.f32 %v231_v57, %v232_v10  ;;  %v239_v33 = vmax.f32 %v237_v58, %v238_v11  ;;  %v262_v34 = vrot.slane %v261_v16, 1 }
  0x2f   :  { %v328_v36 = vmul.f32 %v620_v39, %v585_v15  ;;  %v329_v37 = vmul.f32 %v620_v39, %v587_v21  ;;  %v245_v0 = vmax.f32 %v243_v61, %v244_v23  ;;  %v330_v1 = vmul.f32 %v620_v39, %v589_v22 }
  0x30   :  { %v251_v38 = vmax.f32 %v249_v62, %v250_v25  ;;  %v304_v2 = vsel %vm272_vm0, %v227_v29, %v221_v20  ;;  %v331_v3 = vmul.f32 %v620_v39, %v591_v26  ;;  %v257_v4 = vmax.f32 %v255_v63, %v256_v27 }
  0x31   :  { %v305_v5 = vsel %vm274_vm1, %v233_v30, %v304_v2  ;;  %v332_v7 = vmul.f32 %v620_v39, %v593_v28  ;;  %v263_v15 = vmax.f32 %v261_v16, %v262_v34  ;;  %v333_v21 = vmul.f32 %v620_v39, %v600_v31 }
  0x32   :  { %v306_v8 = vsel %vm276_vm2, %v239_v33, %v305_v5  ;;  %v344_v40 = vsel %vm272_vm0, %v329_v37, %v328_v36  ;;  %v334_v41 = vmul.f32 %v620_v39, %v602_v32  ;;  %v335_v28 = vmul.f32 %v620_v39, %v608_v35 }
  0x33   :  { %v307_v22 = vsel %vm278_vm3, %v245_v0, %v306_v8  ;;  %v345_v42 = vsel %vm274_vm1, %v330_v1, %v344_v40  ;;  %v359_v35 = vstv %s429_s21  ;;  %vm294_vm8 = vcmask 1039360  }
  0x34   :  { %v308_v26 = vsel %vm280_vm4, %v251_v38, %v307_v22  ;;  %v346_v9 = vsel %vm276_vm2, %v331_v3, %v345_v42  ;;  %v360_v39 = vmul.f32 %v359_v35, %v221_v20  ;;  %v361_v44 = vmul.f32 %v359_v35, %v227_v29 }
  0x35   :  { %v309_v43 = vsel %vm282_vm5, %v257_v4, %v308_v26  ;;  %v347_v12 = vsel %vm278_vm3, %v332_v7, %v346_v9  ;;  %v362_v45 = vmul.f32 %v359_v35, %v233_v30  ;;  %v363_v17 = vmul.f32 %v359_v35, %v239_v33 }
  0x36   :  { %v310_v31 = vsel %vm284_vm6, %v263_v15, %v309_v43  ;;  %v348_v13 = vsel %vm280_vm4, %v333_v21, %v347_v12  ;;  %v364_v18 = vmul.f32 %v359_v35, %v245_v0  ;;  %v365_v46 = vmul.f32 %v359_v35, %v251_v38 }
  0x37   :  { %311 = vrot.lane.b32.xlu1 %v310_v31, %s513_s1  ;;  %v349_v32 = vsel %vm282_vm5, %v334_v41, %v348_v13  ;;  %v376_v19 = vsel %vm272_vm0, %v361_v44, %v360_v39  ;;  %v366_v24 = vmul.f32 %v359_v35, %v257_v4  ;;  %v367_v48 = vmul.f32 %v359_v35, %v263_v15 }
  0x38   :  { %v350_v14 = vsel %vm284_vm6, %v335_v28, %v349_v32  ;;  %v377_v47 = vsel %vm274_vm1, %v362_v45, %v376_v19  ;;  %v325_v56 = vstv %s319_s22  ;;  %v353_v58 = vstv %s427_s23 }
  0x39   :  { %v378_v49 = vsel %vm276_vm2, %v363_v17, %v377_v47  ;;  %v356_v63 = vstv %s428_s24  ;;  %v385_v25 = vstv %s430_s25 }
  0x3a   :  { %v379_v50 = vsel %vm278_vm3, %v364_v18, %v378_v49 }
  0x3b   :  { %v380_v51 = vsel %vm280_vm4, %v365_v46, %v379_v50 }
  0x3c   :  { %v381_v52 = vsel %vm282_vm5, %v366_v24, %v380_v51 }
  0x3d   :  { %v382_v53 = vsel %vm284_vm6, %v367_v48, %v381_v52 }
  0x3f   :  { %315 = vrot.lane.b32.xlu1 %v310_v31, %s514_s20 }
  0x98   :  { %v287_v54 = vpop.permute.xlu0 %286 }
  0x99   :  { %v290_v57 = vsel %vm289_vm7, 0.0, %v287_v54 }
  0x9a   :  { %v326_v60 = vmul.f32 %v325_v56, %v290_v57 }
  0x9c   :  { %v352_v62 = vadd.f32 %v350_v14, %v326_v60 }
  0xa0   :  { %v292_v55 = vpop.permute.xlu0 %291 }
  0xa1   :  { %v295_v59 = vsel %vm294_vm8, %v292_v55, 0.0 }
  0xa2   :  { %v354_v61 = vmul.f32 %v353_v58, %v295_v59 }
  0xa4   :  { %v355_v10 = vadd.f32 %v354_v61, %v352_v62 }
  0xa9   :  { %v312_v6 = vpop.permute.xlu1 %311 }
  0xaa   :  { %v314_v11 = vsel %vm289_vm7, 0.0, %v312_v6 }
  0xab   :  { %v357_v16 = vmul.f32 %v356_v63, %v314_v11 }
  0xad   :  { %v358_v20 = vadd.f32 %v357_v16, %v355_v10 }
  0xaf   :  { %v384_v23 = vadd.f32 %v382_v53, %v358_v20 }
  0xb1   :  { %v316_v27 = vpop.permute.xlu1 %315 }
  0xb2   :  { %v318_v29 = vsel %vm294_vm8, %v316_v27, 0.0 }
  0xb3   :  { %v386_v30 = vmul.f32 %v385_v25, %v318_v29 }
  0xb5   :  { %v387_v33 = vadd.f32 %v386_v30, %v384_v23 }
  0xb7   :  { %v431_v34 = vmul.f32 -1.442695, %v387_v33 }
  0xb9   :  { %439 = vpow2.f32 %v431_v34 }
  0xbf   :  { %v440_v36 = vpop.eup %439 }
  0xc0   :  { %v391_v37 = vadd.f32 1.0, %v440_v36 }
  0xc2   :  { %441 = vrcp.f32 %v391_v37  ;;  %v403_v2 = vand.u32 2147483648, %v391_v37  ;;  %v401_v4 = vand.u32 2147483647, %v391_v37  ;;  %vm397_vm10 = vweird.f32 %v391_v37 }
  0xc4   :  { %v404_v7 = vor.u32 1.1754944e-38, %v403_v2  ;;  %vm402_vm12 = vcmp.eq.f32.partialorder %v401_v4, 8.507059e+37 }
  0xc8   :  { %v442_v0 = vpop.eup %441 }
  0xc9   :  { %v393_v1 = vmul.f32 %v442_v0, %v391_v37  ;;  %vm398_vm9 = vweird.f32 %v442_v0 }
  0xca   :  { %vm399_vm11 = vmor %vm397_vm10, %vm398_vm9 }
  0xcb   :  { %v394_v38 = vsub.f32 1.0, %v393_v1 }
  0xcd   :  { %v395_v3 = vmul.f32 %v442_v0, %v394_v38 }
  0xcf   :  { %v396_v5 = vadd.f32 %v442_v0, %v395_v3 }
  0xd1   :  { %v400_v15 = vsel %vm399_vm11, %v442_v0, %v396_v5 }
  0xd2   :  { %v405_v8 = vsel %vm402_vm12, %v404_v7, %v400_v15 }
  0xd3   :  { %407 = vst [vmem:[#allocation9] sm:$0xff] %v405_v8 }
  0xd4   :  { %418 = dma.vmem_to_hbm [thread:$0]  %s414_s27, 128, %s416_s30, [#allocation6]  }
  0xd5   :  { %507 = dma.done.wait [#allocation6], 128  }
  0xd6   :  { %508 = vsyncadd [#allocation6], 4294967168 }
  0xd7   :  { %423 = vsyncpa [#allocation5], 1 }
  0xd8   :  { %424 = vsyncpa [#allocation6], 1 }
  0xd9   :  { %425 = vsyncpa [#allocation7], 1 }

</bundles_post_ra>
